<compile_context>
chip_gen: v7x
topology: tpu7x:2x2x1
jax: 0.10.0
libtpu: 0.0.40
codegen_flags: <defaults>
</compile_context>

<pallas_src>
import functools

import jax
import jax.numpy as jnp
from jax.experimental import pallas as pl
from jax.experimental.pallas import tpu as pltpu


def _round_up(x, m):
    return ((x + m - 1) // m) * m


def _mlp_message_kernel(x_ref, w1_ref, b1_ref, w2_ref, b2_ref, o_ref):
    """Fused 2-layer MLP over one batch tile.

    x_ref:  [TB, R]    raw messages tile
    w1_ref: [R,  Hid]  first linear weight (pre-transposed)
    b1_ref: [1,  Hid]  first bias
    w2_ref: [Hid, Dm]  second linear weight (pre-transposed)
    b2_ref: [1,  Dm]   second bias
    o_ref:  [TB, Dm]   output messages tile
    """
    x = x_ref[...]
    # Layer 1: x @ W1 + b1, ReLU.  MXU matmul, f32 accumulate.
    h = jnp.dot(x, w1_ref[...], preferred_element_type=jnp.float32)
    h = jnp.maximum(h + b1_ref[...], 0.0)
    # Layer 2: h @ W2 + b2.  Cast operand back to the weight dtype so the
    # bf16 MXU path is used when compute_dtype=bf16 (no-op for f32).
    out = jnp.dot(h.astype(w2_ref.dtype), w2_ref[...],
                  preferred_element_type=jnp.float32) + b2_ref[...]
    o_ref[...] = out.astype(o_ref.dtype)


@functools.partial(jax.jit, static_argnames=("block_b", "compute_dtype"))
def mlp_message(raw_messages, w1, b1, w2, b2, *,
                block_b=128, compute_dtype=jnp.float32):
    """Pallas-backed equivalent of MLPMessageFunction.compute_message.

    raw_messages: [B, R] float
    w1: [Hid, R], b1: [Hid]   (torch nn.Linear layout, Hid = R // 2)
    w2: [Dm, Hid], b2: [Dm]   (Dm = message_dim)
    returns: [B, Dm] float32
    """
    B, R = raw_messages.shape
    Hid = w1.shape[0]
    Dm = w2.shape[0]

    # Weight prep (ideally done once at parameter-load time; cheap here).
    w1_t = jnp.transpose(w1).astype(compute_dtype)        # [R, Hid]
    w2_t = jnp.transpose(w2).astype(compute_dtype)        # [Hid, Dm]
    b1_r = b1.astype(jnp.float32).reshape(1, Hid)
    b2_r = b2.astype(jnp.float32).reshape(1, Dm)

    # Batch tiling: sublane-aligned tile, pad batch up to a tile multiple.
    tb = min(block_b, _round_up(B, 8))
    Bp = _round_up(B, tb)
    x = raw_messages.astype(compute_dtype)
    if Bp != B:
        x = jnp.pad(x, ((0, Bp - B), (0, 0)))

    grid = (Bp // tb,)
    out = pl.pallas_call(
        _mlp_message_kernel,
        out_shape=jax.ShapeDtypeStruct((Bp, Dm), jnp.float32),
        grid_spec=pltpu.PrefetchScalarGridSpec(
            num_scalar_prefetch=0,
            grid=grid,
            in_specs=[
                pl.BlockSpec((tb, R), lambda i: (i, 0)),       # x tile
                pl.BlockSpec((R, Hid), lambda i: (0, 0)),      # W1 (resident)
                pl.BlockSpec((1, Hid), lambda i: (0, 0)),      # b1 (resident)
                pl.BlockSpec((Hid, Dm), lambda i: (0, 0)),     # W2 (resident)
                pl.BlockSpec((1, Dm), lambda i: (0, 0)),       # b2 (resident)
            ],
            out_specs=pl.BlockSpec((tb, Dm), lambda i: (i, 0)),
        ),
        compiler_params=pltpu.CompilerParams(
            dimension_semantics=("parallel",)),   # v7x: split tiles over 2 TCs
    )(x, w1_t, b1_r, w2_t, b2_r)

    return out[:B]


def _mlp_reference(raw_messages, w1, b1, w2, b2):
    """Pure-JAX reference of the torch MLP (f32)."""
    h = jnp.maximum(raw_messages @ w1.T + b1, 0.0)
    return h @ w2.T + b2


if __name__ == "__main__":
    # Small shapes consistent with the module: 10 raw messages,
    # raw_message_dim=256 (hidden = 128), message_dim=128.
    B, raw_message_dim, message_dim = 10, 256, 128
    hidden = raw_message_dim // 2

    key = jax.random.PRNGKey(0)
    k_x, k_w1, k_b1, k_w2, k_b2 = jax.random.split(key, 5)

    # PyTorch nn.Linear default init: U(-1/sqrt(fan_in), 1/sqrt(fan_in)).
    bound1 = 1.0 / jnp.sqrt(jnp.float32(raw_message_dim))
    bound2 = 1.0 / jnp.sqrt(jnp.float32(hidden))
    raw_messages = jax.random.normal(k_x, (B, raw_message_dim), jnp.float32)
    w1 = jax.random.uniform(k_w1, (hidden, raw_message_dim), jnp.float32,
                            -bound1, bound1)
    b1 = jax.random.uniform(k_b1, (hidden,), jnp.float32, -bound1, bound1)
    w2 = jax.random.uniform(k_w2, (message_dim, hidden), jnp.float32,
                            -bound2, bound2)
    b2 = jax.random.uniform(k_b2, (message_dim,), jnp.float32, -bound2, bound2)

    ref = _mlp_reference(raw_messages, w1, b1, w2, b2)

    # f32 path: exact-ish match against the reference.
    out_f32 = jax.block_until_ready(
        mlp_message(raw_messages, w1, b1, w2, b2, compute_dtype=jnp.float32))
    assert out_f32.shape == (B, message_dim)
    assert jnp.allclose(out_f32, ref, atol=1e-5, rtol=1e-5), (
        f"f32 mismatch: max abs err {jnp.max(jnp.abs(out_f32 - ref))}")

    # bf16 matmul-operand path (v6e/v7x MXU native); looser tolerance.
    out_bf16 = jax.block_until_ready(
        mlp_message(raw_messages, w1, b1, w2, b2, compute_dtype=jnp.bfloat16))
    assert out_bf16.shape == (B, message_dim)
    assert jnp.allclose(out_bf16, ref, atol=5e-2, rtol=5e-2), (
        f"bf16 mismatch: max abs err {jnp.max(jnp.abs(out_bf16 - ref))}")

    print("KERNEL_OK")
</pallas_src>

<mosaic_0001>
module attributes {stable_mosaic.version = 11 : i64} {
  func.func @_mlp_message_kernel(%arg0: i32, %arg1: memref<16x256xf32, #tpu.memory_space<vmem>>, %arg2: memref<256x128xf32, #tpu.memory_space<vmem>>, %arg3: memref<1x128xf32, #tpu.memory_space<vmem>>, %arg4: memref<128x128xf32, #tpu.memory_space<vmem>>, %arg5: memref<1x128xf32, #tpu.memory_space<vmem>>, %arg6: memref<16x128xf32, #tpu.memory_space<vmem>>) attributes {dimension_semantics = [#tpu.dimension_semantics<parallel>], iteration_bounds = array<i64: 1>, scalar_prefetch = 0 : i64, scratch_operands = 0 : i64, tpu.core_type = #tpu.core_type<tc>, window_params = [{transform_indices = @transform_0, window_bounds = array<i64: 16, 256>}, {pipeline_mode = #tpu.pipeline_mode<synchronous>, transform_indices = @transform_1, window_bounds = array<i64: 256, 128>}, {pipeline_mode = #tpu.pipeline_mode<synchronous>, transform_indices = @transform_2, window_bounds = array<i64: 1, 128>}, {pipeline_mode = #tpu.pipeline_mode<synchronous>, transform_indices = @transform_3, window_bounds = array<i64: 128, 128>}, {pipeline_mode = #tpu.pipeline_mode<synchronous>, transform_indices = @transform_4, window_bounds = array<i64: 1, 128>}, {transform_indices = @transform_5, window_bounds = array<i64: 16, 128>}]} {
    %c0 = arith.constant 0 : index
    %c0_0 = arith.constant 0 : index
    %0 = vector.load %arg1[%c0, %c0_0] : memref<16x256xf32, #tpu.memory_space<vmem>>, vector<16x256xf32>
    %c0_1 = arith.constant 0 : index
    %c0_2 = arith.constant 0 : index
    %1 = vector.load %arg2[%c0_1, %c0_2] : memref<256x128xf32, #tpu.memory_space<vmem>>, vector<256x128xf32>
    %cst = arith.constant dense<0.000000e+00> : vector<16x128xf32>
    %2 = tpu.matmul %0, %1, %cst {dimension_numbers = #tpu.dot_dimension_numbers<[1], [0], [0], [1], [0, 0, 1, 1], [], []>} : vector<16x256xf32>, vector<256x128xf32>, vector<16x128xf32> -> vector<16x128xf32>
    %c0_3 = arith.constant 0 : index
    %c0_4 = arith.constant 0 : index
    %3 = vector.load %arg3[%c0_3, %c0_4] : memref<1x128xf32, #tpu.memory_space<vmem>>, vector<1x128xf32>
    %4 = vector.broadcast %3 : vector<1x128xf32> to vector<16x128xf32>
    %5 = arith.addf %2, %4 : vector<16x128xf32>
    %cst_5 = arith.constant 0.000000e+00 : f32
    %6 = vector.broadcast %cst_5 : f32 to vector<16x128xf32>
    %7 = arith.maximumf %5, %6 : vector<16x128xf32>
    %c0_6 = arith.constant 0 : index
    %c0_7 = arith.constant 0 : index
    %8 = vector.load %arg4[%c0_6, %c0_7] : memref<128x128xf32, #tpu.memory_space<vmem>>, vector<128x128xf32>
    %cst_8 = arith.constant dense<0.000000e+00> : vector<16x128xf32>
    %9 = tpu.matmul %7, %8, %cst_8 {dimension_numbers = #tpu.dot_dimension_numbers<[1], [0], [0], [1], [0, 0, 1, 1], [], []>} : vector<16x128xf32>, vector<128x128xf32>, vector<16x128xf32> -> vector<16x128xf32>
    %c0_9 = arith.constant 0 : index
    %c0_10 = arith.constant 0 : index
    %10 = vector.load %arg5[%c0_9, %c0_10] : memref<1x128xf32, #tpu.memory_space<vmem>>, vector<1x128xf32>
    %11 = vector.broadcast %10 : vector<1x128xf32> to vector<16x128xf32>
    %12 = arith.addf %9, %11 : vector<16x128xf32>
    %c0_11 = arith.constant 0 : index
    %c0_12 = arith.constant 0 : index
    %13 = vector.load %arg6[%c0_11, %c0_12] : memref<16x128xf32, #tpu.memory_space<vmem>>, vector<16x128xf32>
    tpu.vector_store %arg6[%c0_11, %c0_12], %12 {strides = array<i32>} : memref<16x128xf32, #tpu.memory_space<vmem>>, vector<16x128xf32>,
    return
  }
  func.func @transform_0(%arg0: i32) -> (i32, i32) {
    %c0_i32 = arith.constant 0 : i32
    %c0_i32_0 = arith.constant 0 : i32
    return %arg0, %c0_i32 : i32, i32
  }
  func.func @transform_1(%arg0: i32) -> (i32, i32) {
    %c0_i32 = arith.constant 0 : i32
    %c0_i32_0 = arith.constant 0 : i32
    %c0_i32_1 = arith.constant 0 : i32
    return %c0_i32, %c0_i32_0 : i32, i32
  }
  func.func @transform_2(%arg0: i32) -> (i32, i32) {
    %c0_i32 = arith.constant 0 : i32
    %c0_i32_0 = arith.constant 0 : i32
    %c0_i32_1 = arith.constant 0 : i32
    return %c0_i32, %c0_i32_0 : i32, i32
  }
  func.func @transform_3(%arg0: i32) -> (i32, i32) {
    %c0_i32 = arith.constant 0 : i32
    %c0_i32_0 = arith.constant 0 : i32
    %c0_i32_1 = arith.constant 0 : i32
    return %c0_i32, %c0_i32_0 : i32, i32
  }
  func.func @transform_4(%arg0: i32) -> (i32, i32) {
    %c0_i32 = arith.constant 0 : i32
    %c0_i32_0 = arith.constant 0 : i32
    %c0_i32_1 = arith.constant 0 : i32
    return %c0_i32, %c0_i32_0 : i32, i32
  }
  func.func @transform_5(%arg0: i32) -> (i32, i32) {
    %c0_i32 = arith.constant 0 : i32
    %c0_i32_0 = arith.constant 0 : i32
    return %arg0, %c0_i32 : i32, i32
  }
}

</mosaic_0001>

<bundles_post_ra>
// kernel: mlp_message.1
= control target key start
LH: loop header
LB: loop body
LE: loop exit
PB: predicated region body
PF: predicated region fallthrough
CT: control target
= control target key end

     0   :  { %s648_s0 = inlined_call_operand.vmem [shape: f32[16,256], index: 0, kind: input, shape index: {}]   ;;  %s649_s1 = inlined_call_operand.vmem [shape: f32[256,128], index: 1, kind: input, shape index: {}]   ;;  %s650_s2 = inlined_call_operand.vmem [shape: f32[1,128], index: 2, kind: input, shape index: {}]   ;;  %s651_s3 = inlined_call_operand.vmem [shape: f32[128,128], index: 3, kind: input, shape index: {}]   ;;  %s652_s4 = inlined_call_operand.vmem [shape: f32[1,128], index: 4, kind: input, shape index: {}]   ;;  %s653_s5 = inlined_call_operand.hbm [shape: f32[16,128], index: 5, kind: output, shape index: {}]  }
   0x1   :  { %v41_v0 = vld [vmem:[%s649_s1 + $0x80] sm:$0xff]  ;;  %v42_v1 = vld [vmem:[%s649_s1 + $0x88] sm:$0xff]  ;;  %v43_v5 = vld [vmem:[%s649_s1 + $0x90] sm:$0xff] }
   0x2   :  { %v25_v2 = vld [vmem:[%s649_s1] sm:$0xff]  ;;  %v350_v3 = vpack.c.bf16 %v42_v1, %v41_v0  ;;  %v26_v4 = vld [vmem:[%s649_s1 + $0x8] sm:$0xff]  ;;  %v44_v6 = vld [vmem:[%s649_s1 + $0x98] sm:$0xff] }
   0x3   :  { %v352_v7 = vpack.c.bf16 %v26_v4, %v25_v2  ;;  %v354_v8 = vpack.c.bf16 %v44_v6, %v43_v5  ;;  %v27_v9 = vld [vmem:[%s649_s1 + $0x10] sm:$0xff]  ;;  %v28_v10 = vld [vmem:[%s649_s1 + $0x18] sm:$0xff]  ;;  %v45_v11 = vld [vmem:[%s649_s1 + $0xa0] sm:$0xff] }
   0x4   :  { %351 = vmatprep.subr.bf16.mxu0 %v350_v3  ;;  %v46_v12 = vld [vmem:[%s649_s1 + $0xa8] sm:$0xff]  ;;  %v356_v13 = vpack.c.bf16 %v28_v10, %v27_v9  ;;  %v29_v15 = vld [vmem:[%s649_s1 + $0x20] sm:$0xff]  ;;  %v47_v17 = vld [vmem:[%s649_s1 + $0xb0] sm:$0xff] }
   0x5   :  { %353 = vmatpush3.bf16.msra.mxu0 %v352_v7  ;;  %v358_v14 = vpack.c.bf16 %v46_v12, %v45_v11  ;;  %v30_v16 = vld [vmem:[%s649_s1 + $0x28] sm:$0xff]  ;;  %v48_v18 = vld [vmem:[%s649_s1 + $0xb8] sm:$0xff]  ;;  %v31_v21 = vld [vmem:[%s649_s1 + $0x30] sm:$0xff] }
   0x6   :  { %355 = vmatprep.subr.bf16.mxu0 %v354_v8  ;;  %v360_v19 = vpack.c.bf16 %v30_v16, %v29_v15  ;;  %v362_v20 = vpack.c.bf16 %v48_v18, %v47_v17  ;;  %v32_v22 = vld [vmem:[%s649_s1 + $0x38] sm:$0xff]  ;;  %v49_v23 = vld [vmem:[%s649_s1 + $0xc0] sm:$0xff]  ;;  %v50_v24 = vld [vmem:[%s649_s1 + $0xc8] sm:$0xff] }
   0x7   :  { %v22_v25 = vld [vmem:[%s648_s0 + $0x8] sm:$0xff]  ;;  %v33_v26 = vld [vmem:[%s649_s1 + $0x40] sm:$0xff]  ;;  %v364_v27 = vpack.c.bf16 %v32_v22, %v31_v21  ;;  %v143_v30 = vld [vmem:[%s651_s3 + $0x10] sm:$0xff]  ;;  %v366_v31 = vpack.c.bf16 %v50_v24, %v49_v23 }
   0x8   :  { %128 = vmatprep.mubr.f32.mxu0 %v22_v25  ;;  %v141_v28 = vld [vmem:[%s651_s3] sm:$0xff]  ;;  %v142_v29 = vld [vmem:[%s651_s3 + $0x8] sm:$0xff]  ;;  %v51_v33 = vld [vmem:[%s649_s1 + $0xd0] sm:$0xff] }
   0x9   :  { %357 = vmatpush3.bf16.msra.mxu0 %v356_v13  ;;  %v34_v32 = vld [vmem:[%s649_s1 + $0x48] sm:$0xff]  ;;  %v382_v34 = vpack.c.bf16 %v142_v29, %v141_v28  ;;  %v144_v35 = vld [vmem:[%s651_s3 + $0x18] sm:$0xff]  ;;  %v145_v38 = vld [vmem:[%s651_s3 + $0x20] sm:$0xff] }
   0xa   :  { %359 = vmatprep.subr.bf16.mxu0 %v358_v14  ;;  %v52_v36 = vld [vmem:[%s649_s1 + $0xd8] sm:$0xff]  ;;  %v386_v37 = vpack.c.bf16 %v144_v35, %v143_v30  ;;  %v146_v39 = vld [vmem:[%s651_s3 + $0x28] sm:$0xff] }
   0xb   :  { %383 = vmatprep.subr.bf16.mxu1 %v382_v34 }
   0xd   :  { %361 = vmatpush3.bf16.msra.mxu0 %v360_v19 }
   0xe   :  { %363 = vmatprep.subr.bf16.mxu0 %v362_v20 }
   0xf   :  { %10 = vsyncpa [#allocation3], 0  ;;  %v368_v40 = vpack.c.bf16 %v34_v32, %v33_v26  ;;  %385 = vmatpush3.bf16.msra.mxu1 %v382_v34  ;;  %v370_v41 = vpack.c.bf16 %v52_v36, %v51_v33  ;;  %v35_v42 = vld [vmem:[%s649_s1 + $0x50] sm:$0xff]  ;;  %v36_v43 = vld [vmem:[%s649_s1 + $0x58] sm:$0xff]  ;;  %v390_v45 = vpack.c.bf16 %v146_v39, %v145_v38  ;;  %s441_s23 = smov [#allocation2]  }
  0x10   :  { %v53_v44 = vld [vmem:[%s649_s1 + $0xe0] sm:$0xff]  ;;  %387 = vmatprep.subr.bf16.mxu1 %v386_v37  ;;  %v54_v46 = vld [vmem:[%s649_s1 + $0xe8] sm:$0xff]  ;;  %v147_v47 = vld [vmem:[%s651_s3 + $0x30] sm:$0xff]  ;;  %v372_v49 = vpack.c.bf16 %v36_v43, %v35_v42  ;;  %s246_s24 = sshll.u32 %s441_s23, 4  ;;  %s247_s24 = int_to_ptr.vmem [resolvable:$true] %s246_s24 }
  0x11   :  { %365 = vmatpush3.bf16.msra.mxu0 %v364_v27  ;;  %v148_v48 = vld [vmem:[%s651_s3 + $0x38] sm:$0xff]  ;;  %v374_v50 = vpack.c.bf16 %v54_v46, %v53_v44  ;;  %v37_v51 = vld [vmem:[%s649_s1 + $0x60] sm:$0xff]  ;;  %v38_v52 = vld [vmem:[%s649_s1 + $0x68] sm:$0xff]  ;;  %p422_p1 = scmp.lt.s32.totalorder %s247_s24, %s247_s24 }
  0x12   :  { %367 = vmatprep.subr.bf16.mxu0 %v366_v31  ;;  %v55_v53 = vld [vmem:[%s649_s1 + $0xf0] sm:$0xff]  ;;  %v394_v54 = vpack.c.bf16 %v148_v48, %v147_v47  ;;  %v56_v55 = vld [vmem:[%s649_s1 + $0xf8] sm:$0xff]  ;;  %v149_v56 = vld [vmem:[%s651_s3 + $0x40] sm:$0xff]  ;;  %v376_v58 = vpack.c.bf16 %v38_v52, %v37_v51 }
  0x13   :  { %389 = vmatpush3.bf16.msra.mxu1 %v386_v37  ;;  %v150_v57 = vld [vmem:[%s651_s3 + $0x48] sm:$0xff]  ;;  %v378_v59 = vpack.c.bf16 %v56_v55, %v55_v53  ;;  %v39_v60 = vld [vmem:[%s649_s1 + $0x70] sm:$0xff]  ;;  %v40_v61 = vld [vmem:[%s649_s1 + $0x78] sm:$0xff] }
  0x14   :  { %391 = vmatprep.subr.bf16.mxu1 %v390_v45  ;;  %v398_v62 = vpack.c.bf16 %v150_v57, %v149_v56  ;;  %v380_v63 = vpack.c.bf16 %v40_v61, %v39_v60  ;;  %v21_v0 = vld [vmem:[%s648_s0] sm:$0xff]  ;;  %v24_v1 = vld [vmem:[%s648_s0 + $0x18] sm:$0xff]  ;;  %v23_v2 = vld [vmem:[%s648_s0 + $0x10] sm:$0xff] }
  0x15   :  { %369 = vmatpush3.bf16.msra.mxu0 %v368_v40  ;;  %v151_v3 = vld [vmem:[%s651_s3 + $0x50] sm:$0xff]  ;;  %v152_v4 = vld [vmem:[%s651_s3 + $0x58] sm:$0xff]  ;;  %v153_v6 = vld [vmem:[%s651_s3 + $0x60] sm:$0xff] }
  0x16   :  { %371 = vmatprep.subr.bf16.mxu0 %v370_v41  ;;  %v402_v5 = vpack.c.bf16 %v152_v4, %v151_v3  ;;  %v154_v7 = vld [vmem:[%s651_s3 + $0x68] sm:$0xff]  ;;  %v155_v9 = vld [vmem:[%s651_s3 + $0x70] sm:$0xff]  ;;  %v156_v10 = vld [vmem:[%s651_s3 + $0x78] sm:$0xff] }
  0x17   :  { %393 = vmatpush3.bf16.msra.mxu1 %v390_v45  ;;  %v406_v8 = vpack.c.bf16 %v154_v7, %v153_v6  ;;  %v410_v11 = vpack.c.bf16 %v156_v10, %v155_v9  ;;  %v257_v14 = vld [vmem:[%s650_s2] ss:$0 sm:$0xff]  ;;  %s417_s2 = scalar_lea.vmem %s247_s24, 256 }
  0x18   :  { %395 = vmatprep.subr.bf16.mxu1 %v394_v54  ;;  %v258_v23 = vld [vmem:[%s652_s4] ss:$0 sm:$0xff]  ;;  %p418_p0 = scmp.ne.s32.totalorder %s247_s24, %s417_s2  ;;  %p423_p2 = scmp.lt.s32.totalorder %s417_s2, %s417_s2 }
  0x19   :  { %373 = vmatpush3.bf16.msra.mxu0 %v372_v49 }
  0x1a   :  { %375 = vmatprep.subr.bf16.mxu0 %v374_v50  ;;  %p424_p3 = por %p423_p2, %p422_p1 }
  0x1b   :  { %397 = vmatpush3.bf16.msra.mxu1 %v394_v54 }
  0x1c   :  { %399 = vmatprep.subr.bf16.mxu1 %v398_v62  ;;  %p425_p4 = pnand %p424_p3, %p418_p0 }
  0x1d   :  { %377 = vmatpush3.bf16.msra.mxu0 %v376_v58 }
  0x1e   :  { %379 = vmatprep.subr.bf16.mxu0 %v378_v59 }
  0x1f   :  { %401 = vmatpush3.bf16.msra.mxu1 %v398_v62 }
  0x20   :  { %403 = vmatprep.subr.bf16.mxu1 %v402_v5 }
  0x21   :  { %381 = vmatpush3.bf16.msra.mxu0 %v380_v63 }
  0x23   :  { %405 = vmatpush3.bf16.msra.mxu1 %v402_v5 }
  0x24   :  { %129 = vmatmul.mubr.f32.vlgmr.msra.gmra.mrb[0].mxu0 %v21_v0  ;;  %407 = vmatprep.subr.bf16.mxu1 %v406_v8 }
  0x25   :  { %133 = vmatprep.mubr.f32.mxu0 %v24_v1 }
  0x27   :  { %409 = vmatpush3.bf16.msra.mxu1 %v406_v8 }
  0x28   :  { %134 = vmatmul.mubr.f32.gmra.mrb[2].mxu0 %v23_v2  ;;  %411 = vmatprep.subr.bf16.mxu1 %v410_v11 }
  0x2b   :  { %413 = vmatpush3.bf16.msra.mxu1 %v410_v11 }
  0xf7   :  { %v291_v12 = vpop.f32.mrb[0].mxu0 }
  0xf8   :  { %v292_v13 = vpop.f32.mrb[1].mxu0 }
  0xf9   :  { %v293_v15 = vadd.f32 %v292_v13, %v291_v12 }
  0xfb   :  { %v294_v16 = vpop.f32.mrb[2].mxu0  ;;  %v131_v17 = vadd.f32 %v293_v15, %v257_v14 }
  0xfc   :  { %v295_v18 = vpop.f32.mrb[3].mxu0 }
  0xfd   :  { %v296_v19 = vadd.f32 %v295_v18, %v294_v16  ;;  %v139_v20 = vmax.f32 %v131_v17, 0.0 }
  0xff   :  { %v136_v21 = vadd.f32 %v296_v19, %v257_v14  ;;  %347 = vmatprep.mubr.f32.mxu1 %v139_v20 }
 0x101   :  { %v140_v22 = vmax.f32 %v136_v21, 0.0 }
 0x103   :  { %348 = vmatmul.mubr.f32.vlgmr.msra.gmra.mrb[0].mxu1 %v140_v22 }
 0x1d6   :  { %v349_v24 = vpop.f32.mrb[0].mxu1 }
 0x1d7   :  { %v236_v25 = vadd.f32 %v349_v24, %v258_v23  ;;  %v230_v26 = vpop.f32.mrb[1].mxu1 }
 0x1d8   :  { %v231_v27 = vadd.f32 %v258_v23, %v230_v26 }
 0x1d9   :  { %240 = vst [vmem:[#allocation2 + $0x8] sm:$0xff] %v236_v25 }
 0x1da   :  { %239 = vst [vmem:[#allocation2] sm:$0xff] %v231_v27 }
 0x1db   :  { %428 = shalt.err (!%p425_p4)
}
 0x1dc   :  { %s429_s4 = scalar_lea.hbm %s653_s5, 256 }
 0x1dd   :  { %p430_p5 = scmp.ne.s32.totalorder %s653_s5, %s429_s4  ;;  %p433_p6 = scmp.lt.u32.totalorder %s429_s4, %s653_s5 }
 0x1df   :  { %p435_p7 = pnand %p433_p6, %p430_p5 }
 0x1e1   :  { %438 = shalt.err (!%p435_p7)
}
 0x1e2   :  { %s442_s6 = smov 128   ;;  %s443_s7 = smov 8  }
 0x1e3   :  { %252 = dma.vmem_to_hbm [thread:$0]  %s247_s24, 256, %s653_s5, [#allocation3], %s442_s6, %s442_s6, %s443_s7  }
 0x1e4   :  { %439 = dma.done.wait [#allocation3], 256  }
 0x1e5   :  { %440 = vsyncadd [#allocation3], 4294967040 }
 0x1e6   :  { %256 = vsyncpa [#allocation3], 1 }

</bundles_post_ra>
